<compile_context>
chip_gen: v7x
topology: tpu7x:2x2x1
jax: 0.10.0
libtpu: 0.0.40
codegen_flags: <defaults>
</compile_context>

<pallas_src>
import jax
import jax.numpy as jnp
import numpy as np
from jax.experimental import pallas as pl
from jax.experimental.pallas import tpu as pltpu

OBS_DIM = 5
ACT_DIM = 1
HIDDEN_DIM = 512  # matches Actor(hidden_dim=512)
HEAD_DIM = 2 * ACT_DIM  # fused [mu | log_std] head


def actor_kernel(obs_ref, w1_ref, b1_ref, w2_ref, b2_ref, wh_ref, bh_ref, out_ref):
    # fc1 + ReLU  (bf16 MXU inputs, f32 accumulate / elementwise)
    x = obs_ref[...].astype(jnp.bfloat16)                               # (TB, obs_dim)
    h1 = jnp.dot(x, w1_ref[...], preferred_element_type=jnp.float32) + b1_ref[...]
    h1 = jnp.maximum(h1, 0.0)                                           # (TB, H) f32

    # fc2 + ReLU
    h2 = jnp.dot(h1.astype(jnp.bfloat16), w2_ref[...],
                 preferred_element_type=jnp.float32) + b2_ref[...]
    h2 = jnp.maximum(h2, 0.0)                                           # (TB, H) f32

    # fused heads: columns [0:ACT_DIM] = mu, [ACT_DIM:] = log_std
    head = jnp.dot(h2.astype(jnp.bfloat16), wh_ref[...],
                   preferred_element_type=jnp.float32) + bh_ref[...]    # (TB, 2*A)

    # std = exp(clip(log_std, -20, 2)); keep mu columns untouched.
    col = jax.lax.broadcasted_iota(jnp.int32, head.shape, dimension=1)
    std_part = jnp.exp(jnp.clip(head, -20.0, 2.0))
    out_ref[...] = jnp.where(col < ACT_DIM, head, std_part)             # [mu | std]


def _pick_batch_tile(B):
    for tb in (256, 128, 64, 32, 16, 8):
        if B % tb == 0:
            return tb
    return B  # small / odd batch: single full block


def actor_forward(obs, params):
    """Pallas-backed equivalent of Actor.forward: returns (mu, std)."""
    B = obs.shape[0]
    w1, b1, w2, b2, wh, bh = params
    TB = _pick_batch_tile(B)

    def resident(a):  # full-array block, DMA'd once (constant index_map)
        return pl.BlockSpec(a.shape, lambda i: (0, 0))

    out = pl.pallas_call(
        actor_kernel,
        out_shape=jax.ShapeDtypeStruct((B, HEAD_DIM), jnp.float32),
        grid=(pl.cdiv(B, TB),),
        in_specs=[
            pl.BlockSpec((TB, OBS_DIM), lambda i: (i, 0)),   # obs: per-batch tile
            resident(w1), resident(b1),
            resident(w2), resident(b2),
            resident(wh), resident(bh),
        ],
        out_specs=pl.BlockSpec((TB, HEAD_DIM), lambda i: (i, 0)),
        compiler_params=pltpu.CompilerParams(
            dimension_semantics=("parallel",),   # lets v7x shard batch tiles over 2 TCs
            vmem_limit_bytes=16 * 1024 * 1024,
        ),
    )(obs, w1, b1, w2, b2, wh, bh)

    mu = out[:, :ACT_DIM]
    std = out[:, ACT_DIM:]
    return mu, std


def init_params(key):
    """PyTorch-style Linear init: U(-1/sqrt(fan_in), 1/sqrt(fan_in)).
    Weights stored (in_features, out_features); matmul weights cast to bf16;
    mu/log_std heads fused into a single (H, 2*ACT_DIM) weight + (1, 2*ACT_DIM) bias."""
    def linear(k, fan_in, fan_out):
        kw, kb = jax.random.split(k)
        bound = 1.0 / np.sqrt(fan_in)
        w = jax.random.uniform(kw, (fan_in, fan_out), jnp.float32, -bound, bound)
        b = jax.random.uniform(kb, (1, fan_out), jnp.float32, -bound, bound)
        return w, b

    k1, k2, k3, k4 = jax.random.split(key, 4)
    w1, b1 = linear(k1, OBS_DIM, HIDDEN_DIM)
    w2, b2 = linear(k2, HIDDEN_DIM, HIDDEN_DIM)
    wmu, bmu = linear(k3, HIDDEN_DIM, ACT_DIM)
    wls, bls = linear(k4, HIDDEN_DIM, ACT_DIM)
    wh = jnp.concatenate([wmu, wls], axis=1)   # (H, 2*ACT_DIM)
    bh = jnp.concatenate([bmu, bls], axis=1)   # (1, 2*ACT_DIM)
    return (w1.astype(jnp.bfloat16), b1,
            w2.astype(jnp.bfloat16), b2,
            wh.astype(jnp.bfloat16), bh)


def actor_forward_ref(obs, params):
    """Plain-JAX f32 reference mirroring the PyTorch forward (bf16 weights upcast)."""
    w1, b1, w2, b2, wh, bh = params
    w1f, w2f, whf = (w1.astype(jnp.float32), w2.astype(jnp.float32),
                     wh.astype(jnp.float32))
    x = jnp.maximum(obs @ w1f + b1, 0.0)
    x = jnp.maximum(x @ w2f + b2, 0.0)
    head = x @ whf + bh
    mu = head[:, :ACT_DIM]
    log_std = jnp.clip(head[:, ACT_DIM:], -20.0, 2.0)
    return mu, jnp.exp(log_std)


if __name__ == "__main__":
    key = jax.random.PRNGKey(0)
    k_params, k_obs = jax.random.split(key)

    params = init_params(k_params)
    batch = 8
    obs = jax.random.normal(k_obs, (batch, OBS_DIM), jnp.float32)

    mu, std = actor_forward(obs, params)
    jax.block_until_ready((mu, std))

    mu_ref, std_ref = actor_forward_ref(obs, params)
    assert mu.shape == (batch, ACT_DIM) and std.shape == (batch, ACT_DIM)
    # bf16 weights / MXU inputs -> loosened tolerances vs. pure-f32 reference.
    np.testing.assert_allclose(np.asarray(mu), np.asarray(mu_ref), rtol=2e-2, atol=2e-2)
    np.testing.assert_allclose(np.asarray(std), np.asarray(std_ref), rtol=2e-2, atol=2e-2)

    # TODO(synk): Actor.sample / select_action (Normal rsample, tanh squash) are
    # sampling utilities outside forward(); not implemented in-kernel.
    print("KERNEL_OK")
</pallas_src>

<mosaic_0001>
module attributes {stable_mosaic.version = 11 : i64} {
  func.func @actor_kernel(%arg0: i32, %arg1: memref<8x5xf32, #tpu.memory_space<vmem>>, %arg2: memref<5x512xbf16, #tpu.memory_space<vmem>>, %arg3: memref<1x512xf32, #tpu.memory_space<vmem>>, %arg4: memref<512x512xbf16, #tpu.memory_space<vmem>>, %arg5: memref<1x512xf32, #tpu.memory_space<vmem>>, %arg6: memref<512x2xbf16, #tpu.memory_space<vmem>>, %arg7: memref<1x2xf32, #tpu.memory_space<vmem>>, %arg8: memref<8x2xf32, #tpu.memory_space<vmem>>) attributes {dimension_semantics = [#tpu.dimension_semantics<parallel>], iteration_bounds = array<i64: 1>, scalar_prefetch = 0 : i64, scratch_operands = 0 : i64, tpu.core_type = #tpu.core_type<tc>, window_params = [{transform_indices = @transform_0, window_bounds = array<i64: 8, 5>}, {pipeline_mode = #tpu.pipeline_mode<synchronous>, transform_indices = @transform_1, window_bounds = array<i64: 5, 512>}, {pipeline_mode = #tpu.pipeline_mode<synchronous>, transform_indices = @transform_2, window_bounds = array<i64: 1, 512>}, {pipeline_mode = #tpu.pipeline_mode<synchronous>, transform_indices = @transform_3, window_bounds = array<i64: 512, 512>}, {pipeline_mode = #tpu.pipeline_mode<synchronous>, transform_indices = @transform_4, window_bounds = array<i64: 1, 512>}, {pipeline_mode = #tpu.pipeline_mode<synchronous>, transform_indices = @transform_5, window_bounds = array<i64: 512, 2>}, {pipeline_mode = #tpu.pipeline_mode<synchronous>, transform_indices = @transform_6, window_bounds = array<i64: 1, 2>}, {transform_indices = @transform_7, window_bounds = array<i64: 8, 2>}]} {
    %c0 = arith.constant 0 : index
    %c0_0 = arith.constant 0 : index
    %0 = vector.load %arg1[%c0, %c0_0] : memref<8x5xf32, #tpu.memory_space<vmem>>, vector<8x5xf32>
    %1 = arith.truncf %0 : vector<8x5xf32> to vector<8x5xbf16>
    %c0_1 = arith.constant 0 : index
    %c0_2 = arith.constant 0 : index
    %2 = vector.load %arg2[%c0_1, %c0_2] : memref<5x512xbf16, #tpu.memory_space<vmem>>, vector<5x512xbf16>
    %cst = arith.constant dense<0.000000e+00> : vector<8x512xf32>
    %3 = tpu.matmul %1, %2, %cst {dimension_numbers = #tpu.dot_dimension_numbers<[1], [0], [0], [1], [0, 0, 1, 1], [], []>} : vector<8x5xbf16>, vector<5x512xbf16>, vector<8x512xf32> -> vector<8x512xf32>
    %c0_3 = arith.constant 0 : index
    %c0_4 = arith.constant 0 : index
    %4 = vector.load %arg3[%c0_3, %c0_4] : memref<1x512xf32, #tpu.memory_space<vmem>>, vector<1x512xf32>
    %5 = vector.broadcast %4 : vector<1x512xf32> to vector<8x512xf32>
    %6 = arith.addf %3, %5 : vector<8x512xf32>
    %cst_5 = arith.constant 0.000000e+00 : f32
    %7 = vector.broadcast %cst_5 : f32 to vector<8x512xf32>
    %8 = arith.maximumf %6, %7 : vector<8x512xf32>
    %9 = arith.truncf %8 : vector<8x512xf32> to vector<8x512xbf16>
    %c0_6 = arith.constant 0 : index
    %c0_7 = arith.constant 0 : index
    %10 = vector.load %arg4[%c0_6, %c0_7] : memref<512x512xbf16, #tpu.memory_space<vmem>>, vector<512x512xbf16>
    %cst_8 = arith.constant dense<0.000000e+00> : vector<8x512xf32>
    %11 = tpu.matmul %9, %10, %cst_8 {dimension_numbers = #tpu.dot_dimension_numbers<[1], [0], [0], [1], [0, 0, 1, 1], [], []>} : vector<8x512xbf16>, vector<512x512xbf16>, vector<8x512xf32> -> vector<8x512xf32>
    %c0_9 = arith.constant 0 : index
    %c0_10 = arith.constant 0 : index
    %12 = vector.load %arg5[%c0_9, %c0_10] : memref<1x512xf32, #tpu.memory_space<vmem>>, vector<1x512xf32>
    %13 = vector.broadcast %12 : vector<1x512xf32> to vector<8x512xf32>
    %14 = arith.addf %11, %13 : vector<8x512xf32>
    %cst_11 = arith.constant 0.000000e+00 : f32
    %15 = vector.broadcast %cst_11 : f32 to vector<8x512xf32>
    %16 = arith.maximumf %14, %15 : vector<8x512xf32>
    %17 = arith.truncf %16 : vector<8x512xf32> to vector<8x512xbf16>
    %c0_12 = arith.constant 0 : index
    %c0_13 = arith.constant 0 : index
    %18 = vector.load %arg6[%c0_12, %c0_13] : memref<512x2xbf16, #tpu.memory_space<vmem>>, vector<512x2xbf16>
    %cst_14 = arith.constant dense<0.000000e+00> : vector<8x2xf32>
    %19 = tpu.matmul %17, %18, %cst_14 {dimension_numbers = #tpu.dot_dimension_numbers<[1], [0], [0], [1], [0, 0, 1, 1], [], []>} : vector<8x512xbf16>, vector<512x2xbf16>, vector<8x2xf32> -> vector<8x2xf32>
    %c0_15 = arith.constant 0 : index
    %c0_16 = arith.constant 0 : index
    %20 = vector.load %arg7[%c0_15, %c0_16] : memref<1x2xf32, #tpu.memory_space<vmem>>, vector<1x2xf32>
    %21 = vector.broadcast %20 : vector<1x2xf32> to vector<8x2xf32>
    %22 = arith.addf %19, %21 : vector<8x2xf32>
    %23 = tpu.iota {dimensions = array<i32: 1>} : vector<8x2xi32>
    %cst_17 = arith.constant -2.000000e+01 : f32
    %cst_18 = arith.constant 2.000000e+00 : f32
    %24 = vector.broadcast %cst_17 : f32 to vector<8x2xf32>
    %25 = arith.maximumf %24, %22 : vector<8x2xf32>
    %26 = vector.broadcast %cst_18 : f32 to vector<8x2xf32>
    %27 = arith.minimumf %26, %25 : vector<8x2xf32>
    %28 = math.exp %27 : vector<8x2xf32>
    %c1_i32 = arith.constant 1 : i32
    %29 = vector.broadcast %c1_i32 : i32 to vector<8x2xi32>
    %30 = arith.cmpi slt, %23, %29 : vector<8x2xi32>
    %31 = arith.select %30, %22, %28 : vector<8x2xi1>, vector<8x2xf32>
    %c0_19 = arith.constant 0 : index
    %c0_20 = arith.constant 0 : index
    %32 = vector.load %arg8[%c0_19, %c0_20] : memref<8x2xf32, #tpu.memory_space<vmem>>, vector<8x2xf32>
    tpu.vector_store %arg8[%c0_19, %c0_20], %31 {strides = array<i32>} : memref<8x2xf32, #tpu.memory_space<vmem>>, vector<8x2xf32>,
    return
  }
  func.func @transform_0(%arg0: i32) -> (i32, i32) {
    %c0_i32 = arith.constant 0 : i32
    %c0_i32_0 = arith.constant 0 : i32
    return %arg0, %c0_i32 : i32, i32
  }
  func.func @transform_1(%arg0: i32) -> (i32, i32) {
    %c0_i32 = arith.constant 0 : i32
    %c0_i32_0 = arith.constant 0 : i32
    %c0_i32_1 = arith.constant 0 : i32
    return %c0_i32, %c0_i32_0 : i32, i32
  }
  func.func @transform_2(%arg0: i32) -> (i32, i32) {
    %c0_i32 = arith.constant 0 : i32
    %c0_i32_0 = arith.constant 0 : i32
    %c0_i32_1 = arith.constant 0 : i32
    return %c0_i32, %c0_i32_0 : i32, i32
  }
  func.func @transform_3(%arg0: i32) -> (i32, i32) {
    %c0_i32 = arith.constant 0 : i32
    %c0_i32_0 = arith.constant 0 : i32
    %c0_i32_1 = arith.constant 0 : i32
    return %c0_i32, %c0_i32_0 : i32, i32
  }
  func.func @transform_4(%arg0: i32) -> (i32, i32) {
    %c0_i32 = arith.constant 0 : i32
    %c0_i32_0 = arith.constant 0 : i32
    %c0_i32_1 = arith.constant 0 : i32
    return %c0_i32, %c0_i32_0 : i32, i32
  }
  func.func @transform_5(%arg0: i32) -> (i32, i32) {
    %c0_i32 = arith.constant 0 : i32
    %c0_i32_0 = arith.constant 0 : i32
    %c0_i32_1 = arith.constant 0 : i32
    return %c0_i32, %c0_i32_0 : i32, i32
  }
  func.func @transform_6(%arg0: i32) -> (i32, i32) {
    %c0_i32 = arith.constant 0 : i32
    %c0_i32_0 = arith.constant 0 : i32
    %c0_i32_1 = arith.constant 0 : i32
    return %c0_i32, %c0_i32_0 : i32, i32
  }
  func.func @transform_7(%arg0: i32) -> (i32, i32) {
    %c0_i32 = arith.constant 0 : i32
    %c0_i32_0 = arith.constant 0 : i32
    return %arg0, %c0_i32 : i32, i32
  }
}

</mosaic_0001>

<bundles_post_ra>
// kernel: tpu_custom_call.1
= control target key start
LH: loop header
LB: loop body
LE: loop exit
PB: predicated region body
PF: predicated region fallthrough
CT: control target
= control target key end

     0   :  { %12 = vsyncpa [#allocation3], 0  ;;  %s1989_s24 = smov [#allocation2]   ;;  %s2196_s0 = inlined_call_operand.vmem [shape: f32[8,5], index: 0, kind: input, shape index: {}]   ;;  %s2197_s1 = inlined_call_operand.vmem [shape: bf16[5,512], index: 1, kind: input, shape index: {}]   ;;  %s2198_s2 = inlined_call_operand.vmem [shape: f32[1,512], index: 2, kind: input, shape index: {}]   ;;  %s2199_s3 = inlined_call_operand.hbm [shape: bf16[512,512], index: 3, kind: input, shape index: {}]   ;;  %s2200_s4 = inlined_call_operand.vmem [shape: f32[1,512], index: 4, kind: input, shape index: {}]   ;;  %s2201_s5 = inlined_call_operand.vmem [shape: bf16[512,2], index: 5, kind: input, shape index: {}]   ;;  %s2202_s6 = inlined_call_operand.vmem [shape: f32[1,2], index: 6, kind: input, shape index: {}]   ;;  %s2203_s7 = inlined_call_operand.vmem [shape: f32[8,2], index: 7, kind: output, shape index: {}]  }
   0x1   :  { %s24_s25 = sshll.u32 %s1989_s24, 4  ;;  %s1965_s28 = scalar_lea.hbm %s2199_s3, 16384  ;;  %s25_s25 = int_to_ptr.vmem [resolvable:$true] %s24_s25 }
   0x2   :  { %p1966_p0 = scmp.ne.s32.totalorder %s2199_s3, %s1965_s28  ;;  %p1969_p1 = scmp.lt.u32.totalorder %s1965_s28, %s2199_s3 }
   0x4   :  { %p1971_p2 = pnand %p1969_p1, %p1966_p0 }
   0x6   :  { %1974 = shalt.err (!%p1971_p2)
}
   0x7   :  { %s1975_s10 = scalar_lea.vmem %s25_s25, 16384  ;;  %p1980_p4 = scmp.lt.s32.totalorder %s25_s25, %s25_s25 }
   0x8   :  { %p1976_p3 = scmp.ne.s32.totalorder %s25_s25, %s1975_s10  ;;  %p1981_p5 = scmp.lt.s32.totalorder %s1975_s10, %s1975_s10 }
   0xa   :  { %p1982_p6 = por %p1981_p5, %p1980_p4 }
   0xc   :  { %p1983_p7 = pnand %p1982_p6, %p1976_p3 }
   0xe   :  { %1986 = shalt.err (!%p1983_p7)
}
   0xf   :  { %s1990_s11 = smov 256   ;;  %s1991_s12 = smov 16  }
  0x10   :  { %30 = dma.hbm_to_vmem [thread:$0]  %s2199_s3, 16384, %s25_s25, [#allocation3], %s1990_s11, %s1990_s11, %s1991_s12  }
  0x11   :  { %1987 = dma.done.wait [#allocation3], 16384  }
  0x12   :  { %1988 = vsyncadd [#allocation3], 4294950912  ;;  %vm81_vm0 = vcmask 1041408   ;;  %v1992_v0 = vmov 0   ;;  %vm82_vm1 = vcmask 1042432   ;;  %v1993_v1 = vmov 65535  }
  0x13   :  { %129 = vmatprep.mubr.bf16.mxu0 %v1992_v0  ;;  %170 = vmatprep.mubr.bf16.mxu1 %v1992_v0  ;;  %v83_v2 = vsel %vm81_vm0, 4294967295, %v1993_v1  ;;  %v43_v3 = vld [vmem:[%s2197_s1] sm:$0x77]  ;;  %v44_v5 = vld [vmem:[%s2197_s1 + $0x8] sm:$0x77]  ;;  %vm77_vm2 = vcmask 39936  }
  0x14   :  { %v84_v4 = vsel %vm82_vm1, %v83_v2, 0  ;;  %v1508_v6 = vcombine.high %v43_v3, %v43_v3  ;;  %v1507_v7 = vcombine.low %v43_v3, %v43_v3  ;;  %v1510_v8 = vcombine.high %v44_v5, %v44_v5  ;;  %v41_v9 = vld [vmem:[%s2196_s0] sm:$0xff]  ;;  %v1744_v15 = vld [vmem:[#allocation2 + $0xc] ss:$16 sps:$4 sm:$0xff]   ;;  %v1742_v19 = vld [vmem:[#allocation2 + $0x8] ss:$16 sps:$4 sm:$0xff]  }
  0x15   :  { %v1509_v10 = vcombine.low %v44_v5, %v44_v5  ;;  %v1741_v14 = vld [vmem:[#allocation2 + $0x4] ss:$16 sps:$4 sm:$0xff]   ;;  %v42_v17 = vpack.c.bf16 %v41_v9, %v41_v9  ;;  %v1739_v18 = vld [vmem:[#allocation2] ss:$16 sps:$4 sm:$0xff]   ;;  %v1750_v21 = vld [vmem:[#allocation2 + $0x2c] ss:$16 sps:$4 sm:$0xff]  }
  0x16   :  { %v89_v11 = vand.u32 %v1508_v6, %v84_v4  ;;  %v86_v12 = vand.u32 %v1507_v7, %v84_v4  ;;  %v95_v13 = vand.u32 %v1510_v8, %v84_v4  ;;  %v1747_v20 = vld [vmem:[#allocation2 + $0x24] ss:$16 sps:$4 sm:$0xff]   ;;  %v1745_v22 = vld [vmem:[#allocation2 + $0x20] ss:$16 sps:$4 sm:$0xff]   ;;  %v1748_v23 = vld [vmem:[#allocation2 + $0x28] ss:$16 sps:$4 sm:$0xff]  }
  0x17   :  { %v92_v16 = vand.u32 %v1509_v10, %v84_v4  ;;  %v1753_v24 = vld [vmem:[#allocation2 + $0x44] ss:$16 sps:$4 sm:$0xff]   ;;  %v1756_v25 = vld [vmem:[#allocation2 + $0x4c] ss:$16 sps:$4 sm:$0xff]   ;;  %v1751_v26 = vld [vmem:[#allocation2 + $0x40] ss:$16 sps:$4 sm:$0xff]  }
  0x18   :  { %97 = vmatprep.subr.bf16.mxu0 %v89_v11  ;;  %138 = vmatprep.subr.bf16.mxu1 %v95_v13  ;;  %v1754_v27 = vld [vmem:[#allocation2 + $0x48] ss:$16 sps:$4 sm:$0xff]   ;;  %v1759_v28 = vld [vmem:[#allocation2 + $0x64] ss:$16 sps:$4 sm:$0xff]   ;;  %v1762_v29 = vld [vmem:[#allocation2 + $0x6c] ss:$16 sps:$4 sm:$0xff]  }
  0x19   :  { %98 = vmatpush1.bf16.msra.mxu0 %v86_v12  ;;  %139 = vmatpush1.bf16.msra.mxu1 %v92_v16  ;;  %v1757_v30 = vld [vmem:[#allocation2 + $0x60] ss:$16 sps:$4 sm:$0xff]   ;;  %v1760_v31 = vld [vmem:[#allocation2 + $0x68] ss:$16 sps:$4 sm:$0xff]   ;;  %v1765_v32 = vld [vmem:[#allocation2 + $0x84] ss:$16 sps:$4 sm:$0xff]  }
  0x1a   :  { %977 = vmatprep.subr.bf16.mxu0 %v1741_v14  ;;  %1059 = vmatprep.subr.bf16.mxu1 %v1744_v15  ;;  %v1768_v33 = vld [vmem:[#allocation2 + $0x8c] ss:$16 sps:$4 sm:$0xff]   ;;  %v1763_v34 = vld [vmem:[#allocation2 + $0x80] ss:$16 sps:$4 sm:$0xff]   ;;  %v1766_v35 = vld [vmem:[#allocation2 + $0x88] ss:$16 sps:$4 sm:$0xff]  }
  0x1b   :  { %v1771_v36 = vld [vmem:[#allocation2 + $0xa4] ss:$16 sps:$4 sm:$0xff]   ;;  %v1774_v37 = vld [vmem:[#allocation2 + $0xac] ss:$16 sps:$4 sm:$0xff]   ;;  %v1769_v38 = vld [vmem:[#allocation2 + $0xa0] ss:$16 sps:$4 sm:$0xff]  }
  0x1c   :  { %1511 = vmatmul.mubr.msk.bf16.vlgmr.msra.gmra.mrb[0].mxu0 %vm77_vm2, %v42_v17  ;;  %1512 = vmatmul.mubr.msk.bf16.vlgmr.msra.gmra.mrb[0].mxu1 %vm77_vm2, %v42_v17  ;;  %v1772_v39 = vld [vmem:[#allocation2 + $0xa8] ss:$16 sps:$4 sm:$0xff]   ;;  %v1777_v40 = vld [vmem:[#allocation2 + $0xc4] ss:$16 sps:$4 sm:$0xff]   ;;  %v1780_v41 = vld [vmem:[#allocation2 + $0xcc] ss:$16 sps:$4 sm:$0xff]  }
  0x1d   :  { %978 = vmatpush1.bf16.msra.mxu0 %v1739_v18  ;;  %1060 = vmatpush1.bf16.msra.mxu1 %v1742_v19  ;;  %v1775_v42 = vld [vmem:[#allocation2 + $0xc0] ss:$16 sps:$4 sm:$0xff]   ;;  %v1778_v43 = vld [vmem:[#allocation2 + $0xc8] ss:$16 sps:$4 sm:$0xff]   ;;  %v1783_v44 = vld [vmem:[#allocation2 + $0xe4] ss:$16 sps:$4 sm:$0xff]   ;;  %v47_v18 = vlaneseq }
  0x1e   :  { %979 = vmatprep.subr.bf16.mxu0 %v1747_v20  ;;  %1061 = vmatprep.subr.bf16.mxu1 %v1750_v21  ;;  %v1786_v45 = vld [vmem:[#allocation2 + $0xec] ss:$16 sps:$4 sm:$0xff]   ;;  %v1781_v46 = vld [vmem:[#allocation2 + $0xe0] ss:$16 sps:$4 sm:$0xff]   ;;  %v1784_v47 = vld [vmem:[#allocation2 + $0xe8] ss:$16 sps:$4 sm:$0xff]  }
  0x1f   :  { %v1789_v48 = vld [vmem:[#allocation2 + $0x104] ss:$16 sps:$4 sm:$0xff]   ;;  %v1792_v49 = vld [vmem:[#allocation2 + $0x10c] ss:$16 sps:$4 sm:$0xff]   ;;  %v1787_v50 = vld [vmem:[#allocation2 + $0x100] ss:$16 sps:$4 sm:$0xff]  }
  0x20   :  { %v1790_v51 = vld [vmem:[#allocation2 + $0x108] ss:$16 sps:$4 sm:$0xff]   ;;  %v1795_v52 = vld [vmem:[#allocation2 + $0x124] ss:$16 sps:$4 sm:$0xff]   ;;  %v1798_v53 = vld [vmem:[#allocation2 + $0x12c] ss:$16 sps:$4 sm:$0xff]  }
  0x21   :  { %980 = vmatpush1.bf16.msra.mxu0 %v1745_v22  ;;  %1062 = vmatpush1.bf16.msra.mxu1 %v1748_v23  ;;  %v1793_v54 = vld [vmem:[#allocation2 + $0x120] ss:$16 sps:$4 sm:$0xff]   ;;  %v1796_v55 = vld [vmem:[#allocation2 + $0x128] ss:$16 sps:$4 sm:$0xff]   ;;  %v1801_v56 = vld [vmem:[#allocation2 + $0x144] ss:$16 sps:$4 sm:$0xff]  }
  0x22   :  { %981 = vmatprep.subr.bf16.mxu0 %v1753_v24  ;;  %1063 = vmatprep.subr.bf16.mxu1 %v1756_v25  ;;  %v1804_v57 = vld [vmem:[#allocation2 + $0x14c] ss:$16 sps:$4 sm:$0xff]   ;;  %v1799_v58 = vld [vmem:[#allocation2 + $0x140] ss:$16 sps:$4 sm:$0xff]   ;;  %v1802_v59 = vld [vmem:[#allocation2 + $0x148] ss:$16 sps:$4 sm:$0xff]  }
  0x23   :  { %v1807_v60 = vld [vmem:[#allocation2 + $0x164] ss:$16 sps:$4 sm:$0xff]   ;;  %v1810_v61 = vld [vmem:[#allocation2 + $0x16c] ss:$16 sps:$4 sm:$0xff]   ;;  %v1805_v62 = vld [vmem:[#allocation2 + $0x160] ss:$16 sps:$4 sm:$0xff]  }
  0x24   :  { %v1808_v63 = vld [vmem:[#allocation2 + $0x168] ss:$16 sps:$4 sm:$0xff]   ;;  %v1813_v0 = vld [vmem:[#allocation2 + $0x184] ss:$16 sps:$4 sm:$0xff]   ;;  %v1816_v1 = vld [vmem:[#allocation2 + $0x18c] ss:$16 sps:$4 sm:$0xff]  }
  0x25   :  { %982 = vmatpush1.bf16.msra.mxu0 %v1751_v26  ;;  %1064 = vmatpush1.bf16.msra.mxu1 %v1754_v27  ;;  %v1811_v2 = vld [vmem:[#allocation2 + $0x180] ss:$16 sps:$4 sm:$0xff]   ;;  %v1814_v3 = vld [vmem:[#allocation2 + $0x188] ss:$16 sps:$4 sm:$0xff]   ;;  %v1819_v4 = vld [vmem:[#allocation2 + $0x1a4] ss:$16 sps:$4 sm:$0xff]  }
  0x26   :  { %983 = vmatprep.subr.bf16.mxu0 %v1759_v28  ;;  %1065 = vmatprep.subr.bf16.mxu1 %v1762_v29  ;;  %v1822_v5 = vld [vmem:[#allocation2 + $0x1ac] ss:$16 sps:$4 sm:$0xff]   ;;  %v1817_v6 = vld [vmem:[#allocation2 + $0x1a0] ss:$16 sps:$4 sm:$0xff]   ;;  %v1820_v7 = vld [vmem:[#allocation2 + $0x1a8] ss:$16 sps:$4 sm:$0xff]  }
  0x27   :  { %v1825_v8 = vld [vmem:[#allocation2 + $0x1c4] ss:$16 sps:$4 sm:$0xff]   ;;  %v1828_v9 = vld [vmem:[#allocation2 + $0x1cc] ss:$16 sps:$4 sm:$0xff]   ;;  %v1823_v10 = vld [vmem:[#allocation2 + $0x1c0] ss:$16 sps:$4 sm:$0xff]  }
  0x28   :  { %v1826_v11 = vld [vmem:[#allocation2 + $0x1c8] ss:$16 sps:$4 sm:$0xff]   ;;  %v1831_v12 = vld [vmem:[#allocation2 + $0x1e4] ss:$16 sps:$4 sm:$0xff]   ;;  %v1834_v13 = vld [vmem:[#allocation2 + $0x1ec] ss:$16 sps:$4 sm:$0xff]  }
  0x29   :  { %984 = vmatpush1.bf16.msra.mxu0 %v1757_v30  ;;  %1066 = vmatpush1.bf16.msra.mxu1 %v1760_v31  ;;  %v1829_v14 = vld [vmem:[#allocation2 + $0x1e0] ss:$16 sps:$4 sm:$0xff]   ;;  %v1832_v15 = vld [vmem:[#allocation2 + $0x1e8] ss:$16 sps:$4 sm:$0xff]   ;;  %v1837_v16 = vld [vmem:[#allocation2 + $0x204] ss:$16 sps:$4 sm:$0xff]  }
  0x2a   :  { %985 = vmatprep.subr.bf16.mxu0 %v1765_v32  ;;  %1067 = vmatprep.subr.bf16.mxu1 %v1768_v33  ;;  %v1840_v17 = vld [vmem:[#allocation2 + $0x20c] ss:$16 sps:$4 sm:$0xff]   ;;  %v2056_v19 = vshrl.u32 %v47_v18, 7  ;;  %v2062_v21 = vld [vmem:[%s2198_s2] sm:$0xf]  ;;  %vm1500_vm4 = vcmask 15360  }
  0x2c   :  { %v49_v20 = vsub.s32 0, %v2056_v19  ;;  %v53_v22 = vsub.s32 1, %v2056_v19  ;;  %v61_v23 = vsub.s32 3, %v2056_v19 }
  0x2d   :  { %986 = vmatpush1.bf16.msra.mxu0 %v1763_v34  ;;  %1068 = vmatpush1.bf16.msra.mxu1 %v1766_v35 }
  0x2e   :  { %987 = vmatprep.subr.bf16.mxu0 %v1771_v36  ;;  %1069 = vmatprep.subr.bf16.mxu1 %v1774_v37  ;;  %v50_v24 = vrot.slane %v2062_v21, %v49_v20  ;;  %v54_v25 = vrot.slane %v2062_v21, %v53_v22  ;;  %v62_v26 = vrot.slane %v2062_v21, %v61_v23 }
  0x31   :  { %988 = vmatpush1.bf16.msra.mxu0 %v1769_v38  ;;  %1070 = vmatpush1.bf16.msra.mxu1 %v1772_v39 }
  0x32   :  { %989 = vmatprep.subr.bf16.mxu0 %v1777_v40  ;;  %1071 = vmatprep.subr.bf16.mxu1 %v1780_v41 }
  0x35   :  { %990 = vmatpush1.bf16.msra.mxu0 %v1775_v42  ;;  %1072 = vmatpush1.bf16.msra.mxu1 %v1778_v43  ;;  %v1835_v42 = vld [vmem:[#allocation2 + $0x200] ss:$16 sps:$4 sm:$0xff]   ;;  %v1838_v43 = vld [vmem:[#allocation2 + $0x208] ss:$16 sps:$4 sm:$0xff]  }
  0x36   :  { %991 = vmatprep.subr.bf16.mxu0 %v1783_v44  ;;  %1073 = vmatprep.subr.bf16.mxu1 %v1786_v45  ;;  %v1843_v45 = vld [vmem:[#allocation2 + $0x224] ss:$16 sps:$4 sm:$0xff]  }
  0x39   :  { %992 = vmatpush1.bf16.msra.mxu0 %v1781_v46  ;;  %1074 = vmatpush1.bf16.msra.mxu1 %v1784_v47  ;;  %v1846_v46 = vld [vmem:[#allocation2 + $0x22c] ss:$16 sps:$4 sm:$0xff]  }
  0x3a   :  { %993 = vmatprep.subr.bf16.mxu0 %v1789_v48  ;;  %1075 = vmatprep.subr.bf16.mxu1 %v1792_v49  ;;  %v1841_v48 = vld [vmem:[#allocation2 + $0x220] ss:$16 sps:$4 sm:$0xff]   ;;  %v1844_v49 = vld [vmem:[#allocation2 + $0x228] ss:$16 sps:$4 sm:$0xff]  }
  0x3d   :  { %994 = vmatpush1.bf16.msra.mxu0 %v1787_v50  ;;  %1076 = vmatpush1.bf16.msra.mxu1 %v1790_v51  ;;  %v1849_v50 = vld [vmem:[#allocation2 + $0x244] ss:$16 sps:$4 sm:$0xff]   ;;  %v1852_v51 = vld [vmem:[#allocation2 + $0x24c] ss:$16 sps:$4 sm:$0xff]  }
  0x3e   :  { %995 = vmatprep.subr.bf16.mxu0 %v1795_v52  ;;  %1077 = vmatprep.subr.bf16.mxu1 %v1798_v53  ;;  %v1847_v52 = vld [vmem:[#allocation2 + $0x240] ss:$16 sps:$4 sm:$0xff]   ;;  %v1850_v53 = vld [vmem:[#allocation2 + $0x248] ss:$16 sps:$4 sm:$0xff]  }
  0x41   :  { %996 = vmatpush1.bf16.msra.mxu0 %v1793_v54  ;;  %1078 = vmatpush1.bf16.msra.mxu1 %v1796_v55  ;;  %v1855_v54 = vld [vmem:[#allocation2 + $0x264] ss:$16 sps:$4 sm:$0xff]   ;;  %v1858_v55 = vld [vmem:[#allocation2 + $0x26c] ss:$16 sps:$4 sm:$0xff]  }
  0x42   :  { %997 = vmatprep.subr.bf16.mxu0 %v1801_v56  ;;  %1079 = vmatprep.subr.bf16.mxu1 %v1804_v57  ;;  %v1853_v56 = vld [vmem:[#allocation2 + $0x260] ss:$16 sps:$4 sm:$0xff]   ;;  %v1856_v57 = vld [vmem:[#allocation2 + $0x268] ss:$16 sps:$4 sm:$0xff]  }
  0x45   :  { %998 = vmatpush1.bf16.msra.mxu0 %v1799_v58  ;;  %1080 = vmatpush1.bf16.msra.mxu1 %v1802_v59  ;;  %v1861_v58 = vld [vmem:[#allocation2 + $0x284] ss:$16 sps:$4 sm:$0xff]   ;;  %v1864_v59 = vld [vmem:[#allocation2 + $0x28c] ss:$16 sps:$4 sm:$0xff]  }
  0x46   :  { %999 = vmatprep.subr.bf16.mxu0 %v1807_v60  ;;  %1081 = vmatprep.subr.bf16.mxu1 %v1810_v61  ;;  %v1859_v60 = vld [vmem:[#allocation2 + $0x280] ss:$16 sps:$4 sm:$0xff]   ;;  %v1862_v61 = vld [vmem:[#allocation2 + $0x288] ss:$16 sps:$4 sm:$0xff]  }
  0x49   :  { %1000 = vmatpush1.bf16.msra.mxu0 %v1805_v62  ;;  %1082 = vmatpush1.bf16.msra.mxu1 %v1808_v63  ;;  %v1867_v62 = vld [vmem:[#allocation2 + $0x2a4] ss:$16 sps:$4 sm:$0xff]   ;;  %v1870_v63 = vld [vmem:[#allocation2 + $0x2ac] ss:$16 sps:$4 sm:$0xff]  }
  0x4a   :  { %1001 = vmatprep.subr.bf16.mxu0 %v1813_v0  ;;  %1083 = vmatprep.subr.bf16.mxu1 %v1816_v1  ;;  %v1865_v0 = vld [vmem:[#allocation2 + $0x2a0] ss:$16 sps:$4 sm:$0xff]   ;;  %v1868_v1 = vld [vmem:[#allocation2 + $0x2a8] ss:$16 sps:$4 sm:$0xff]  }
  0x4d   :  { %1002 = vmatpush1.bf16.msra.mxu0 %v1811_v2  ;;  %1084 = vmatpush1.bf16.msra.mxu1 %v1814_v3  ;;  %v1873_v2 = vld [vmem:[#allocation2 + $0x2c4] ss:$16 sps:$4 sm:$0xff]   ;;  %v1876_v3 = vld [vmem:[#allocation2 + $0x2cc] ss:$16 sps:$4 sm:$0xff]  }
  0x4e   :  { %1003 = vmatprep.subr.bf16.mxu0 %v1819_v4  ;;  %1085 = vmatprep.subr.bf16.mxu1 %v1822_v5  ;;  %v1871_v4 = vld [vmem:[#allocation2 + $0x2c0] ss:$16 sps:$4 sm:$0xff]   ;;  %v1874_v5 = vld [vmem:[#allocation2 + $0x2c8] ss:$16 sps:$4 sm:$0xff]  }
  0x51   :  { %1004 = vmatpush1.bf16.msra.mxu0 %v1817_v6  ;;  %1086 = vmatpush1.bf16.msra.mxu1 %v1820_v7  ;;  %v1879_v6 = vld [vmem:[#allocation2 + $0x2e4] ss:$16 sps:$4 sm:$0xff]   ;;  %v1882_v7 = vld [vmem:[#allocation2 + $0x2ec] ss:$16 sps:$4 sm:$0xff]  }
  0x52   :  { %1005 = vmatprep.subr.bf16.mxu0 %v1825_v8  ;;  %1087 = vmatprep.subr.bf16.mxu1 %v1828_v9  ;;  %v1877_v8 = vld [vmem:[#allocation2 + $0x2e0] ss:$16 sps:$4 sm:$0xff]   ;;  %v1880_v9 = vld [vmem:[#allocation2 + $0x2e8] ss:$16 sps:$4 sm:$0xff]  }
  0x55   :  { %1006 = vmatpush1.bf16.msra.mxu0 %v1823_v10  ;;  %1088 = vmatpush1.bf16.msra.mxu1 %v1826_v11  ;;  %v1885_v10 = vld [vmem:[#allocation2 + $0x304] ss:$16 sps:$4 sm:$0xff]   ;;  %v1888_v11 = vld [vmem:[#allocation2 + $0x30c] ss:$16 sps:$4 sm:$0xff]  }
  0x56   :  { %1007 = vmatprep.subr.bf16.mxu0 %v1831_v12  ;;  %1089 = vmatprep.subr.bf16.mxu1 %v1834_v13  ;;  %v1883_v12 = vld [vmem:[#allocation2 + $0x300] ss:$16 sps:$4 sm:$0xff]   ;;  %v1886_v13 = vld [vmem:[#allocation2 + $0x308] ss:$16 sps:$4 sm:$0xff]  }
  0x59   :  { %1008 = vmatpush1.bf16.msra.mxu0 %v1829_v14  ;;  %1090 = vmatpush1.bf16.msra.mxu1 %v1832_v15  ;;  %v1891_v14 = vld [vmem:[#allocation2 + $0x324] ss:$16 sps:$4 sm:$0xff]   ;;  %v1894_v15 = vld [vmem:[#allocation2 + $0x32c] ss:$16 sps:$4 sm:$0xff]  }
  0x5a   :  { %1018 = vmatprep.subr.bf16.mxu0 %v1837_v16  ;;  %1100 = vmatprep.subr.bf16.mxu1 %v1840_v17  ;;  %v1889_v16 = vld [vmem:[#allocation2 + $0x320] ss:$16 sps:$4 sm:$0xff]   ;;  %v1892_v17 = vld [vmem:[#allocation2 + $0x328] ss:$16 sps:$4 sm:$0xff]  }
  0xef   :  { %v131_v27 = vpop.f32.mrb[0].mxu0  ;;  %v2075_v28 = vpop.f32.mrb[0].mxu1 }
  0xf0   :  { %v132_v29 = vadd.f32 %v131_v27, %v50_v24  ;;  %v133_v30 = vpop.f32.mrb[1].mxu0  ;;  %v174_v31 = vpop.f32.mrb[1].mxu1  ;;  %v1897_v24 = vld [vmem:[#allocation2 + $0x344] ss:$16 sps:$4 sm:$0xff]   ;;  %v1898_v27 = vld [vmem:[#allocation2 + $0x348] ss:$16 sps:$4 sm:$0xff]  }
  0xf1   :  { %v134_v32 = vadd.f32 %v133_v30, %v54_v25  ;;  %v135_v33 = vpop.f32.mrb[2].mxu0  ;;  %v175_v34 = vadd.f32 %v174_v31, %v62_v26  ;;  %v176_v35 = vpop.f32.mrb[2].mxu1  ;;  %v1900_v25 = vld [vmem:[#allocation2 + $0x34c] ss:$16 sps:$4 sm:$0xff]   ;;  %v1895_v26 = vld [vmem:[#allocation2 + $0x340] ss:$16 sps:$4 sm:$0xff]  }
  0xf2   :  { %v179_v36 = vmax.f32 %v132_v29, 0.0  ;;  %v136_v37 = vpop.f32.mrb[3].mxu0  ;;  %v177_v38 = vpop.f32.mrb[3].mxu1  ;;  %v1903_v29 = vld [vmem:[#allocation2 + $0x364] ss:$16 sps:$4 sm:$0xff]  }
  0xf3   :  { %v180_v39 = vmax.f32 %v134_v32, 0.0  ;;  %v182_v40 = vmax.f32 %v175_v34, 0.0  ;;  %v1906_v30 = vld [vmem:[#allocation2 + $0x36c] ss:$16 sps:$4 sm:$0xff]   ;;  %v1901_v31 = vld [vmem:[#allocation2 + $0x360] ss:$16 sps:$4 sm:$0xff]  }
  0xf4   :  { %v183_v44 = vpack.c.bf16 %v179_v36, %v179_v36  ;;  %v1904_v32 = vld [vmem:[#allocation2 + $0x368] ss:$16 sps:$4 sm:$0xff]   ;;  %v1909_v33 = vld [vmem:[#allocation2 + $0x384] ss:$16 sps:$4 sm:$0xff]   ;;  %v1912_v34 = vld [vmem:[#allocation2 + $0x38c] ss:$16 sps:$4 sm:$0xff]  }
  0xf5   :  { %v184_v41 = vpack.c.bf16 %v180_v39, %v180_v39  ;;  %v186_v47 = vpack.c.bf16 %v182_v40, %v182_v40  ;;  %v1907_v35 = vld [vmem:[#allocation2 + $0x380] ss:$16 sps:$4 sm:$0xff]   ;;  %v1910_v36 = vld [vmem:[#allocation2 + $0x388] ss:$16 sps:$4 sm:$0xff]   ;;  %v57_v37 = vsub.s32 2, %v2056_v19 }
  0xf6   :  { %v1915_v38 = vld [vmem:[#allocation2 + $0x3a4] ss:$16 sps:$4 sm:$0xff]   ;;  %v1918_v39 = vld [vmem:[#allocation2 + $0x3ac] ss:$16 sps:$4 sm:$0xff]   ;;  %v1913_v40 = vld [vmem:[#allocation2 + $0x3a0] ss:$16 sps:$4 sm:$0xff]  }
  0xf7   :  { %1009 = vmatprep.mubr.bf16.mxu0 %v184_v41  ;;  %1091 = vmatprep.mubr.bf16.mxu1 %v184_v41  ;;  %v1916_v41 = vld [vmem:[#allocation2 + $0x3a8] ss:$16 sps:$4 sm:$0xff]  }
  0xf8   :  { %1010 = vmatmul.mubr.bf16.vlgmr.msra.gmra.mrb[4].mxu0 %v183_v44  ;;  %1092 = vmatmul.mubr.bf16.vlgmr.msra.gmra.mrb[4].mxu1 %v183_v44  ;;  %v1924_v44 = vld [vmem:[#allocation2 + $0x3cc] ss:$16 sps:$4 sm:$0xff]  }
  0xf9   :  { %1019 = vmatpush1.bf16.msra.mxu0 %v1835_v42  ;;  %1101 = vmatpush1.bf16.msra.mxu1 %v1838_v43  ;;  %v58_v42 = vrot.slane %v2062_v21, %v57_v37  ;;  %v1921_v43 = vld [vmem:[#allocation2 + $0x3c4] ss:$16 sps:$4 sm:$0xff]  }
  0xfa   :  { %1020 = vmatprep.subr.bf16.mxu0 %v1843_v45  ;;  %1102 = vmatprep.subr.bf16.mxu1 %v1846_v46  ;;  %v1919_v45 = vld [vmem:[#allocation2 + $0x3c0] ss:$16 sps:$4 sm:$0xff]   ;;  %v1922_v46 = vld [vmem:[#allocation2 + $0x3c8] ss:$16 sps:$4 sm:$0xff]  }
  0xfb   :  { %1050 = vmatprep.mubr.bf16.mxu0 %v186_v47  ;;  %1132 = vmatprep.mubr.bf16.mxu1 %v186_v47  ;;  %v173_v47 = vadd.f32 %v2075_v28, %v58_v42  ;;  %v1931_v21 = vld [vmem:[%s2201_s5 + $0x40] sm:$0xff]  }
  0xfc   :  { %v1933_v28 = vld [vmem:[%s2201_s5] sm:$0xff]  }
  0xfd   :  { %1021 = vmatpush1.bf16.msra.mxu0 %v1841_v48  ;;  %1103 = vmatpush1.bf16.msra.mxu1 %v1844_v49  ;;  %v1927_v48 = vld [vmem:[#allocation2 + $0x3e4] ss:$16 sps:$4 sm:$0xff]   ;;  %v1930_v49 = vld [vmem:[#allocation2 + $0x3ec] ss:$16 sps:$4 sm:$0xff]  }
  0xfe   :  { %1022 = vmatprep.subr.bf16.mxu0 %v1849_v50  ;;  %1104 = vmatprep.subr.bf16.mxu1 %v1852_v51  ;;  %v1925_v50 = vld [vmem:[#allocation2 + $0x3e0] ss:$16 sps:$4 sm:$0xff]   ;;  %v1928_v51 = vld [vmem:[#allocation2 + $0x3e8] ss:$16 sps:$4 sm:$0xff]  }
 0x101   :  { %1023 = vmatpush1.bf16.msra.mxu0 %v1847_v52  ;;  %1105 = vmatpush1.bf16.msra.mxu1 %v1850_v53  ;;  %v181_v52 = vmax.f32 %v173_v47, 0.0  ;;  %v1932_v53 = vld [vmem:[%s2201_s5 + $0xc0] sm:$0xff]  }
 0x102   :  { %1024 = vmatprep.subr.bf16.mxu0 %v1855_v54  ;;  %1106 = vmatprep.subr.bf16.mxu1 %v1858_v55  ;;  %v1934_v54 = vld [vmem:[%s2201_s5 + $0x80] sm:$0xff]  }
 0x103   :  { %v185_v55 = vpack.c.bf16 %v181_v52, %v181_v52 }
 0x105   :  { %1025 = vmatpush1.bf16.msra.mxu0 %v1853_v56  ;;  %1107 = vmatpush1.bf16.msra.mxu1 %v1856_v57  ;;  %v1935_v56 = vld [vmem:[%s2201_s5 + $0x48] sm:$0xff]  }
 0x106   :  { %1026 = vmatprep.subr.bf16.mxu0 %v1861_v58  ;;  %1108 = vmatprep.subr.bf16.mxu1 %v1864_v59  ;;  %v1936_v57 = vld [vmem:[%s2201_s5 + $0xc8] sm:$0xff]  }
 0x107   :  { %v1937_v58 = vld [vmem:[%s2201_s5 + $0x8] sm:$0xff]  }
 0x108   :  { %v1938_v59 = vld [vmem:[%s2201_s5 + $0x88] sm:$0xff]  }
 0x109   :  { %1027 = vmatpush1.bf16.msra.mxu0 %v1859_v60  ;;  %1109 = vmatpush1.bf16.msra.mxu1 %v1862_v61  ;;  %v1939_v60 = vld [vmem:[%s2201_s5 + $0x50] sm:$0xff]  }
 0x10a   :  { %1028 = vmatprep.subr.bf16.mxu0 %v1867_v62  ;;  %1110 = vmatprep.subr.bf16.mxu1 %v1870_v63  ;;  %v1940_v61 = vld [vmem:[%s2201_s5 + $0xd0] sm:$0xff]  }
 0x10b   :  { %v1941_v62 = vld [vmem:[%s2201_s5 + $0x10] sm:$0xff]  }
 0x10c   :  { %v1942_v63 = vld [vmem:[%s2201_s5 + $0x90] sm:$0xff]  }
 0x10d   :  { %1029 = vmatpush1.bf16.msra.mxu0 %v1865_v0  ;;  %1111 = vmatpush1.bf16.msra.mxu1 %v1868_v1  ;;  %v1943_v0 = vld [vmem:[%s2201_s5 + $0x58] sm:$0xff]  }
 0x10e   :  { %1030 = vmatprep.subr.bf16.mxu0 %v1873_v2  ;;  %1112 = vmatprep.subr.bf16.mxu1 %v1876_v3  ;;  %v1944_v1 = vld [vmem:[%s2201_s5 + $0xd8] sm:$0xff]  }
 0x10f   :  { %v1945_v2 = vld [vmem:[%s2201_s5 + $0x18] sm:$0xff]  }
 0x110   :  { %v1946_v3 = vld [vmem:[%s2201_s5 + $0x98] sm:$0xff]  }
 0x111   :  { %1031 = vmatpush1.bf16.msra.mxu0 %v1871_v4  ;;  %1113 = vmatpush1.bf16.msra.mxu1 %v1874_v5  ;;  %v1947_v4 = vld [vmem:[%s2201_s5 + $0x60] sm:$0xff]  }
 0x112   :  { %1032 = vmatprep.subr.bf16.mxu0 %v1879_v6  ;;  %1114 = vmatprep.subr.bf16.mxu1 %v1882_v7  ;;  %v1948_v5 = vld [vmem:[%s2201_s5 + $0xe0] sm:$0xff]  }
 0x113   :  { %v1949_v6 = vld [vmem:[%s2201_s5 + $0x20] sm:$0xff]  }
 0x114   :  { %v1950_v7 = vld [vmem:[%s2201_s5 + $0xa0] sm:$0xff]  }
 0x115   :  { %1033 = vmatpush1.bf16.msra.mxu0 %v1877_v8  ;;  %1115 = vmatpush1.bf16.msra.mxu1 %v1880_v9  ;;  %v1951_v8 = vld [vmem:[%s2201_s5 + $0x68] sm:$0xff]  }
 0x116   :  { %1034 = vmatprep.subr.bf16.mxu0 %v1885_v10  ;;  %1116 = vmatprep.subr.bf16.mxu1 %v1888_v11  ;;  %v1952_v9 = vld [vmem:[%s2201_s5 + $0xe8] sm:$0xff]  }
 0x117   :  { %v1953_v10 = vld [vmem:[%s2201_s5 + $0x28] sm:$0xff]  }
 0x118   :  { %v1954_v11 = vld [vmem:[%s2201_s5 + $0xa8] sm:$0xff]  }
 0x119   :  { %1035 = vmatpush1.bf16.msra.mxu0 %v1883_v12  ;;  %1117 = vmatpush1.bf16.msra.mxu1 %v1886_v13  ;;  %v1955_v12 = vld [vmem:[%s2201_s5 + $0x70] sm:$0xff]  }
 0x11a   :  { %1036 = vmatprep.subr.bf16.mxu0 %v1891_v14  ;;  %1118 = vmatprep.subr.bf16.mxu1 %v1894_v15  ;;  %v1956_v13 = vld [vmem:[%s2201_s5 + $0xf0] sm:$0xff]  }
 0x11b   :  { %v1957_v14 = vld [vmem:[%s2201_s5 + $0x30] sm:$0xff]  }
 0x11c   :  { %v1958_v15 = vld [vmem:[%s2201_s5 + $0xb0] sm:$0xff]  }
 0x11d   :  { %1037 = vmatpush1.bf16.msra.mxu0 %v1889_v16  ;;  %1119 = vmatpush1.bf16.msra.mxu1 %v1892_v17  ;;  %v1959_v16 = vld [vmem:[%s2201_s5 + $0x78] sm:$0xff]  }
 0x11e   :  { %1038 = vmatprep.subr.bf16.mxu0 %v1897_v24  ;;  %1120 = vmatprep.subr.bf16.mxu1 %v1900_v25  ;;  %v1960_v17 = vld [vmem:[%s2201_s5 + $0xf8] sm:$0xff]  }
 0x11f   :  { %v1961_v24 = vld [vmem:[%s2201_s5 + $0x38] sm:$0xff]  }
 0x120   :  { %v1962_v25 = vld [vmem:[%s2201_s5 + $0xb8] sm:$0xff]  }
 0x121   :  { %1039 = vmatpush1.bf16.msra.mxu0 %v1895_v26  ;;  %1121 = vmatpush1.bf16.msra.mxu1 %v1898_v27  ;;  %v315_v26 = vld [vmem:[%s2200_s4] sm:$0xf] }
 0x122   :  { %1040 = vmatprep.subr.bf16.mxu0 %v1903_v29  ;;  %1122 = vmatprep.subr.bf16.mxu1 %v1906_v30  ;;  %v320_v27 = vrot.slane %v315_v26, %v49_v20  ;;  %v328_v29 = vrot.slane %v315_v26, %v57_v37  ;;  %v324_v30 = vrot.slane %v315_v26, %v53_v22 }
 0x125   :  { %1041 = vmatpush1.bf16.msra.mxu0 %v1901_v31  ;;  %1123 = vmatpush1.bf16.msra.mxu1 %v1904_v32  ;;  %v332_v31 = vrot.slane %v315_v26, %v61_v23 }
 0x126   :  { %1042 = vmatprep.subr.bf16.mxu0 %v1909_v33  ;;  %1124 = vmatprep.subr.bf16.mxu1 %v1912_v34 }
 0x129   :  { %1043 = vmatpush1.bf16.msra.mxu0 %v1907_v35  ;;  %1125 = vmatpush1.bf16.msra.mxu1 %v1910_v36 }
 0x12a   :  { %1044 = vmatprep.subr.bf16.mxu0 %v1915_v38  ;;  %1126 = vmatprep.subr.bf16.mxu1 %v1918_v39 }
 0x12d   :  { %1045 = vmatpush1.bf16.msra.mxu0 %v1913_v40  ;;  %1127 = vmatpush1.bf16.msra.mxu1 %v1916_v41 }
 0x12e   :  { %1046 = vmatprep.subr.bf16.mxu0 %v1921_v43  ;;  %1128 = vmatprep.subr.bf16.mxu1 %v1924_v44 }
 0x131   :  { %1047 = vmatpush1.bf16.msra.mxu0 %v1919_v45  ;;  %1129 = vmatpush1.bf16.msra.mxu1 %v1922_v46 }
 0x132   :  { %1048 = vmatprep.subr.bf16.mxu0 %v1927_v48  ;;  %1130 = vmatprep.subr.bf16.mxu1 %v1930_v49 }
 0x135   :  { %1049 = vmatpush1.bf16.msra.mxu0 %v1925_v50  ;;  %1131 = vmatpush1.bf16.msra.mxu1 %v1928_v51  ;;  %v1641_v50 = vld [vmem:[%s2202_s6] ss:$0 sm:$0xff] }
 0x136   :  { %1674 = vmatprep.subr.bf16.mxu0 %v1931_v21  ;;  %1696 = vmatprep.subr.bf16.mxu1 %v1932_v53 }
 0x138   :  { %1051 = vmatmul.mubr.bf16.vlgmr.msra.gmra.mrb[4].mxu0 %v185_v55  ;;  %1133 = vmatmul.mubr.bf16.vlgmr.msra.gmra.mrb[4].mxu1 %v185_v55 }
 0x139   :  { %1675 = vmatpush3.bf16.msra.mxu0 %v1933_v28  ;;  %1697 = vmatpush3.bf16.msra.mxu1 %v1934_v54 }
 0x13a   :  { %1676 = vmatprep.subr.bf16.mxu0 %v1935_v56  ;;  %1698 = vmatprep.subr.bf16.mxu1 %v1936_v57 }
 0x13d   :  { %1677 = vmatpush3.bf16.msra.mxu0 %v1937_v58  ;;  %1699 = vmatpush3.bf16.msra.mxu1 %v1938_v59 }
 0x13e   :  { %1678 = vmatprep.subr.bf16.mxu0 %v1939_v60  ;;  %1700 = vmatprep.subr.bf16.mxu1 %v1940_v61 }
 0x141   :  { %1679 = vmatpush3.bf16.msra.mxu0 %v1941_v62  ;;  %1701 = vmatpush3.bf16.msra.mxu1 %v1942_v63  ;;  %v1493_v62 = vand.u32 127, %v47_v18 }
 0x142   :  { %1680 = vmatprep.subr.bf16.mxu0 %v1943_v0  ;;  %1702 = vmatprep.subr.bf16.mxu1 %v1944_v1 }
 0x143   :  { %vm1498_vm3 = vcmp.lt.s32.totalorder %v1493_v62, 1 }
 0x145   :  { %1681 = vmatpush3.bf16.msra.mxu0 %v1945_v2  ;;  %1703 = vmatpush3.bf16.msra.mxu1 %v1946_v3 }
 0x146   :  { %1682 = vmatprep.subr.bf16.mxu0 %v1947_v4  ;;  %1704 = vmatprep.subr.bf16.mxu1 %v1948_v5 }
 0x149   :  { %1683 = vmatpush3.bf16.msra.mxu0 %v1949_v6  ;;  %1705 = vmatpush3.bf16.msra.mxu1 %v1950_v7 }
 0x14a   :  { %1684 = vmatprep.subr.bf16.mxu0 %v1951_v8  ;;  %1706 = vmatprep.subr.bf16.mxu1 %v1952_v9 }
 0x14d   :  { %1685 = vmatpush3.bf16.msra.mxu0 %v1953_v10  ;;  %1707 = vmatpush3.bf16.msra.mxu1 %v1954_v11 }
 0x14e   :  { %1686 = vmatprep.subr.bf16.mxu0 %v1955_v12  ;;  %1708 = vmatprep.subr.bf16.mxu1 %v1956_v13 }
 0x151   :  { %1687 = vmatpush3.bf16.msra.mxu0 %v1957_v14  ;;  %1709 = vmatpush3.bf16.msra.mxu1 %v1958_v15 }
 0x152   :  { %1688 = vmatprep.subr.bf16.mxu0 %v1959_v16  ;;  %1710 = vmatprep.subr.bf16.mxu1 %v1960_v17 }
 0x155   :  { %1689 = vmatpush3.bf16.msra.mxu0 %v1961_v24  ;;  %1711 = vmatpush3.bf16.msra.mxu1 %v1962_v25 }
 0x20b   :  { %v1052_v32 = vpop.f32.mrb[4].mxu0  ;;  %v1134_v33 = vpop.f32.mrb[4].mxu1 }
 0x20c   :  { %v1718_v34 = vadd.f32 %v1052_v32, %v320_v27  ;;  %v1720_v35 = vadd.f32 %v1134_v33, %v328_v29  ;;  %v1054_v36 = vpop.f32.mrb[5].mxu0  ;;  %v1136_v38 = vpop.f32.mrb[5].mxu1 }
 0x20d   :  { %v1719_v39 = vadd.f32 %v1054_v36, %v324_v30  ;;  %v1721_v40 = vadd.f32 %v1136_v38, %v332_v31  ;;  %v1056_v41 = vpop.f32.mrb[6].mxu0  ;;  %v1138_v42 = vpop.f32.mrb[6].mxu1 }
 0x20e   :  { %v1141_v20 = vmax.f32 %v1718_v34, 0.0  ;;  %v1143_v43 = vmax.f32 %v1720_v35, 0.0  ;;  %v1057_v44 = vpop.f32.mrb[7].mxu0  ;;  %v1139_v37 = vpop.f32.mrb[7].mxu1 }
 0x20f   :  { %v1142_v45 = vmax.f32 %v1719_v39, 0.0  ;;  %v1144_v46 = vmax.f32 %v1721_v40, 0.0 }
 0x210   :  { %v1145_v19 = vpack.c.bf16 %v1141_v20, %v1141_v20  ;;  %v1147_v23 = vpack.c.bf16 %v1143_v43, %v1143_v43 }
 0x211   :  { %v1146_v22 = vpack.c.bf16 %v1142_v45, %v1142_v45  ;;  %v1148_v47 = vpack.c.bf16 %v1144_v46, %v1144_v46 }
 0x213   :  { %1444 = vmatprep.mubr.bf16.mxu0 %v1146_v22  ;;  %1484 = vmatprep.mubr.bf16.mxu1 %v1148_v47 }
 0x214   :  { %1445 = vmatmul.mubr.bf16.vlgmr.msra.gmra.mrb[8].mxu0 %v1145_v19  ;;  %1485 = vmatmul.mubr.bf16.vlgmr.msra.gmra.mrb[8].mxu1 %v1147_v23 }
 0x2e7   :  { %v1690_v48 = vpop.f32.mrb[8].mxu0  ;;  %v1712_v49 = vpop.f32.mrb[8].mxu1 }
 0x2e8   :  { %v1691_v51 = vpop.f32.mrb[9].mxu0  ;;  %v1713_v52 = vpop.f32.mrb[9].mxu1 }
 0x2e9   :  { %v1692_v21 = vadd.f32 %v1691_v51, %v1690_v48  ;;  %v1714_v53 = vadd.f32 %v1713_v52, %v1712_v49  ;;  %v1693_v28 = vpop.f32.mrb[10].mxu0  ;;  %v1715_v54 = vpop.f32.mrb[10].mxu1 }
 0x2ea   :  { %v1694_v55 = vpop.f32.mrb[11].mxu0  ;;  %v1716_v56 = vpop.f32.mrb[11].mxu1 }
 0x2eb   :  { %v1447_v57 = vadd.f32 %v1692_v21, %v1641_v50 }
 0x2ed   :  { %v1487_v58 = vadd.f32 %v1714_v53, %v1447_v57 }
 0x2ef   :  { %v1494_v59 = vmax.f32 %v1487_v58, -20.0 }
 0x2f1   :  { %v1495_v60 = vmin.f32 %v1494_v59, 2.0 }
 0x2f3   :  { %v1496_v61 = vmul.f32 1.442695, %v1495_v60 }
 0x2f5   :  { %1963 = vpow2.f32 %v1496_v61 }
 0x2ff   :  { %v1964_v63 = vpop.eup %1963 }
 0x300   :  { %v1499_v0 = vsel %vm1498_vm3, %v1487_v58, %v1964_v63 }
 0x301   :  { %1501 = vst.msk [vmem:[%s2203_s7] sm:$0xff] %vm1500_vm4, %v1499_v0 }
 0x302   :  { %1506 = vsyncpa [#allocation3], 1 }

</bundles_post_ra>
